<compile_context>
chip_gen: v7x
topology: tpu7x:2x2x1
jax: 0.10.0
libtpu: 0.0.40
codegen_flags: <defaults>
</compile_context>

<pallas_src>
import functools

import jax
import jax.numpy as jnp
from jax.experimental import pallas as pl
from jax.experimental.pallas import tpu as pltpu


# ------------------------------- helpers ------------------------------------

def _round_up(x, m):
    return ((x + m - 1) // m) * m


def _pad2d(x, rows, cols):
    r, c = x.shape
    if r == rows and c == cols:
        return x
    return jnp.pad(x, ((0, rows - r), (0, cols - c)))


# --------------------------- tiled matmul kernel -----------------------------

def _matmul_kernel(a_ref, b_ref, o_ref, acc_ref):
    @pl.when(pl.program_id(2) == 0)
    def _():
        acc_ref[...] = jnp.zeros_like(acc_ref)

    acc_ref[...] += jnp.dot(a_ref[...], b_ref[...],
                            preferred_element_type=jnp.float32)

    @pl.when(pl.program_id(2) == pl.num_programs(2) - 1)
    def _():
        o_ref[...] = acc_ref[...].astype(o_ref.dtype)


def pallas_matmul(a, b, *, tm=256, tn=256, tk=512, out_dtype=jnp.float32):
    """(M,K)@(K,N) -> (M,N). bf16 operands, f32 MXU accumulation, tiled grid."""
    M, K = a.shape
    K2, N = b.shape
    assert K == K2
    a = a.astype(jnp.bfloat16)
    b = b.astype(jnp.bfloat16)
    tm = min(tm, _round_up(M, 8))
    tk = min(tk, _round_up(K, 128))
    tn = min(tn, _round_up(N, 128))
    Mp, Kp, Np = _round_up(M, tm), _round_up(K, tk), _round_up(N, tn)
    a = _pad2d(a, Mp, Kp)
    b = _pad2d(b, Kp, Np)
    out = pl.pallas_call(
        _matmul_kernel,
        out_shape=jax.ShapeDtypeStruct((Mp, Np), out_dtype),
        grid_spec=pltpu.PrefetchScalarGridSpec(
            num_scalar_prefetch=0,
            grid=(Mp // tm, Np // tn, Kp // tk),
            in_specs=[pl.BlockSpec((tm, tk), lambda i, j, k: (i, k)),
                      pl.BlockSpec((tk, tn), lambda i, j, k: (k, j))],
            out_specs=pl.BlockSpec((tm, tn), lambda i, j, k: (i, j)),
            scratch_shapes=[pltpu.VMEM((tm, tn), jnp.float32)]),
        compiler_params=pltpu.CompilerParams(
            dimension_semantics=("parallel", "parallel", "arbitrary")),
    )(a, b)
    if (Mp, Np) != (M, N):
        out = out[:M, :N]
    return out


def segment_sum_pallas(index, values, num_segments):
    """Scatter-add over `index` expressed as a bf16 one-hot matmul on the MXU."""
    one_hot = (index[None, :] ==
               jnp.arange(num_segments, dtype=index.dtype)[:, None])
    return pallas_matmul(one_hot.astype(jnp.bfloat16), values)


# ----------------------- fused per-edge attention kernel ---------------------

def _edge_attn_kernel(eh_ref, a_t_ref, a2_ref, expand_ref, w_ref, e_ref, *, alpha):
    # edge_m for all heads in one MXU matmul: (tE, H*d)
    m = jnp.dot(eh_ref[...], a_t_ref[...], preferred_element_type=jnp.float32)
    # per-head attention scores (a_2 reduction folded into a tiny matmul): (tE, H)
    s = jnp.dot(m, a2_ref[...], preferred_element_type=jnp.float32)
    # edge_e = exp(-leaky_relu(scores))      (EUP exp, VPU select)
    ee = jnp.exp(-jnp.where(s > 0, s, alpha * s))
    # broadcast each head's edge_e over its d output columns: (tE, H*d)
    ee_b = jnp.dot(ee, expand_ref[...], preferred_element_type=jnp.float32)
    w_ref[...] = (m * ee_b).astype(w_ref.dtype)
    e_ref[...] = ee.astype(e_ref.dtype)


def edge_attention_fused(edge_h, a_stack, a2_stack, alpha, nheads, out_dim, te=512):
    """All heads of one SpGraphAttentionLayer direction, tiled over edges.

    Returns (edge_w, edge_e) with edge_w: (E, H*d) weighted edge features and
    edge_e: (E, H) the softmax numerators, both bf16 (fed straight to the MXU
    segment-sum).
    """
    E, F = edge_h.shape
    hd = nheads * out_dim
    eye = jnp.eye(nheads, dtype=jnp.float32)
    a_t = a_stack.T.astype(jnp.bfloat16)                                      # (F, H*d)
    a2_sel = (a2_stack.astype(jnp.float32)[:, :, None]
              * eye[:, None, :]).reshape(hd, nheads)                          # (H*d, H)
    expand = jnp.kron(eye, jnp.ones((1, out_dim), jnp.float32))               # (H, H*d)

    te = min(te, _round_up(E, 8))
    Ep = _round_up(E, te)
    eh = _pad2d(edge_h.astype(jnp.bfloat16), Ep, F)

    w, e = pl.pallas_call(
        functools.partial(_edge_attn_kernel, alpha=float(alpha)),
        out_shape=(jax.ShapeDtypeStruct((Ep, hd), jnp.bfloat16),
                   jax.ShapeDtypeStruct((Ep, nheads), jnp.bfloat16)),
        grid=(Ep // te,),
        in_specs=[pl.BlockSpec((te, F), lambda i: (i, 0)),
                  pl.BlockSpec((F, hd), lambda i: (0, 0)),
                  pl.BlockSpec((hd, nheads), lambda i: (0, 0)),
                  pl.BlockSpec((nheads, hd), lambda i: (0, 0))],
        out_specs=[pl.BlockSpec((te, hd), lambda i: (i, 0)),
                   pl.BlockSpec((te, nheads), lambda i: (i, 0))],
        compiler_params=pltpu.CompilerParams(dimension_semantics=("parallel",)),
    )(eh, a_t, a2_sel, expand)
    return w[:E], e[:E]


# ------------------ fused rowsum-divide + ELU + MergeLayer -------------------

def _attn_merge_kernel(cin_ref, cout_ref, expand_ref, o_ref, *, hd, lam):
    exp_m = expand_ref[...]

    def side(c):
        w, r = c[:, :hd], c[:, hd:]
        # e_rowsum[e_rowsum == 0] = 1e-12, broadcast per head over its d columns
        den = jnp.dot(jnp.where(r == 0.0, 1e-12, r), exp_m,
                      preferred_element_type=jnp.float32)
        h = w / den
        return jnp.where(h > 0, h, jnp.exp(h) - 1.0)          # ELU

    h_in = side(cin_ref[...])
    h_out = side(cout_ref[...])
    o_ref[...] = lam * h_out + (1.0 - lam) * h_in


def attn_finalize_merge(comb_in, comb_out, nheads, out_dim, lam, tn=512):
    """comb_* = [scattered edge_w | per-head rowsum] of shape (N, H*d + H)."""
    N, C = comb_in.shape
    hd = nheads * out_dim
    expand = jnp.kron(jnp.eye(nheads, dtype=jnp.float32),
                      jnp.ones((1, out_dim), jnp.float32))
    tn = min(tn, _round_up(N, 8))
    Np = _round_up(N, tn)
    ci = _pad2d(comb_in.astype(jnp.float32), Np, C)
    co = _pad2d(comb_out.astype(jnp.float32), Np, C)
    out = pl.pallas_call(
        # merge lambda folded in as a compile-time scalar (avoids a (1,1) VMEM DMA)
        functools.partial(_attn_merge_kernel, hd=hd, lam=float(lam)),
        out_shape=jax.ShapeDtypeStruct((Np, hd), jnp.float32),
        grid=(Np // tn,),
        in_specs=[pl.BlockSpec((tn, C), lambda i: (i, 0)),
                  pl.BlockSpec((tn, C), lambda i: (i, 0)),
                  pl.BlockSpec((nheads, hd), lambda i: (0, 0))],
        out_specs=pl.BlockSpec((tn, hd), lambda i: (i, 0)),
        compiler_params=pltpu.CompilerParams(dimension_semantics=("parallel",)),
    )(ci, co, expand)
    return out[:N]


# ------------------- final mask-add + L2-normalize kernel --------------------

def _finalize_kernel(up_ref, x_ref, mask_ref, o_ref):
    combined = up_ref[...] + mask_ref[...] * x_ref[...]
    norm = jnp.sqrt(jnp.sum(combined * combined, axis=1, keepdims=True))
    o_ref[...] = combined / jnp.maximum(norm, 1e-12)


def pallas_finalize(entities_upgraded, out_entity, mask, tn=512):
    N, D = out_entity.shape
    tn = min(tn, _round_up(N, 8))
    Np = _round_up(N, tn)
    up = _pad2d(entities_upgraded.astype(jnp.float32), Np, D)
    xo = _pad2d(out_entity.astype(jnp.float32), Np, D)
    mk = _pad2d(mask.reshape(N, 1).astype(jnp.float32), Np, 1)
    out = pl.pallas_call(
        _finalize_kernel,
        out_shape=jax.ShapeDtypeStruct((Np, D), jnp.float32),
        grid=(Np // tn,),
        in_specs=[pl.BlockSpec((tn, D), lambda i: (i, 0)),
                  pl.BlockSpec((tn, D), lambda i: (i, 0)),
                  pl.BlockSpec((tn, 1), lambda i: (i, 0))],
        out_specs=pl.BlockSpec((tn, D), lambda i: (i, 0)),
        compiler_params=pltpu.CompilerParams(dimension_semantics=("parallel",)),
    )(up, xo, mk)
    return out[:N]


# ----------------------------- graph layers ----------------------------------

def sp_graph_attention_mh(x, edge, edge_embed, edge_nhop, edge_embed_nhop,
                          a_stack, a2_stack, alpha, nheads, out_dim):
    """All heads of one direction of SpGraphAttentionLayer.

    Returns (N, H*d + H): scattered weighted features plus per-head rowsums,
    produced by a single fused edge kernel and a single one-hot MXU matmul.
    """
    N = x.shape[0]
    if edge_nhop is not None:
        edge = jnp.concatenate([edge, edge_nhop], axis=1)
        edge_embed = jnp.concatenate([edge_embed, edge_embed_nhop], axis=0)
    # edge-major, feature-lane-dense layout: (E, 2*in_dim + rel_dim); no transposes.
    # TODO(synk): the three gathers could ride a PrefetchScalarGridSpec
    #             pl.Element row-gather instead of an XLA gather.
    edge_h = jnp.concatenate([x[edge[0]], x[edge[1]], edge_embed], axis=1)
    edge_w, edge_e = edge_attention_fused(edge_h, a_stack, a2_stack,
                                          alpha, nheads, out_dim)
    vals = jnp.concatenate([edge_w, edge_e], axis=1)           # (E, H*d + H)
    return segment_sum_pallas(edge[0], vals, N)                # (N, H*d + H)


def relation_layer(params, g_initial, c_ijk, edge_type, num_relation):
    """RelationLayer.forward: W projection, scatter_mean over edge_type, residual."""
    E = c_ijk.shape[0]
    h_ijk = pallas_matmul(c_ijk, params["W"])                               # (E, Dout)
    # fuse the count column into the same one-hot matmul (scatter_mean)
    vals = jnp.concatenate([h_ijk, jnp.ones((E, 1), jnp.float32)], axis=1)
    seg = segment_sum_pallas(edge_type, vals, num_relation)                 # (R, Dout+1)
    sums, counts = seg[:, :-1], seg[:, -1:]
    g = sums / jnp.maximum(counts, 1.0)
    g_prime = pallas_matmul(g_initial, params["weights_rel"].T) + g
    return g_prime


def spgat_forward(params, entity_embeddings, relation_embed, edge_list, edge_type,
                  edge_embed, edge_list_nhop, edge_type_nhop, alpha, num_relation):
    """SpGAT.forward."""
    edge_list_outbound = jnp.stack([edge_list[1], edge_list[0]])
    edge_list_nhop_outbound = (jnp.stack([edge_list_nhop[1], edge_list_nhop[0]])
                               if edge_list_nhop is not None else None)
    x = entity_embeddings
    if edge_type_nhop is not None:
        edge_embed_nhop = (relation_embed[edge_type_nhop[:, 0]]
                           + relation_embed[edge_type_nhop[:, 1]])
    else:
        edge_embed_nhop = None

    # ---- layer 1: all heads batched into one stacked weight ----
    heads = params["attentions_inbound"]
    H = len(heads)
    out1 = heads[0]["a"].shape[0]
    a_stack = jnp.concatenate([h["a"] for h in heads], axis=0)     # (H*out1, F)
    a2_stack = jnp.stack([h["a_2"][0] for h in heads], axis=0)     # (H, out1)

    comb_in = sp_graph_attention_mh(x, edge_list, edge_embed, edge_list_nhop,
                                    edge_embed_nhop, a_stack, a2_stack,
                                    alpha, H, out1)
    # NOTE: reference code reuses the *inbound* heads for the outbound pass (bug preserved).
    comb_out = sp_graph_attention_mh(x, edge_list_outbound, edge_embed,
                                     edge_list_nhop_outbound, edge_embed_nhop,
                                     a_stack, a2_stack, alpha, H, out1)
    # fused: divide-by-rowsum + per-head ELU (concat=True) + MergeLayer
    x = attn_finalize_merge(comb_in, comb_out, H, out1,
                            params["merge_input_lambda"])
    # dropout(x) is identity (p = 0 / eval)

    out_relation_1 = relation_layer(params["rel_layer"], relation_embed,
                                    edge_embed, edge_type, num_relation)

    edge_embed2 = out_relation_1[edge_type]
    if edge_type_nhop is not None:
        edge_embed_nhop2 = (out_relation_1[edge_type_nhop[:, 0]]
                            + out_relation_1[edge_type_nhop[:, 1]])
    else:
        edge_embed_nhop2 = None

    # ---- layer 2 (out_att, concat=False, single "head" of width Dout) ----
    oa = params["out_att_inbound"]
    Dout = oa["a"].shape[0]
    comb_in2 = sp_graph_attention_mh(x, edge_list, edge_embed2, edge_list_nhop,
                                     edge_embed_nhop2, oa["a"], oa["a_2"],
                                     alpha, 1, Dout)
    # NOTE: reference code uses out_att_inbound for both directions (bug preserved).
    comb_out2 = sp_graph_attention_mh(x, edge_list_outbound, edge_embed2,
                                      edge_list_nhop_outbound, edge_embed_nhop2,
                                      oa["a"], oa["a_2"], alpha, 1, Dout)
    # fused: divide-by-rowsum + outer F.elu + MergeLayer
    x = attn_finalize_merge(comb_in2, comb_out2, 1, Dout,
                            params["merge_output_lambda"])
    return x, out_relation_1


def spkbgat_forward(params, adj, batch_inputs, train_indices_nhop, alpha):
    """SpKBGATModified.forward."""
    edge_list, edge_type = adj
    if train_indices_nhop is not None:
        edge_list_nhop = jnp.stack([train_indices_nhop[:, 3], train_indices_nhop[:, 0]])
        edge_type_nhop = jnp.stack([train_indices_nhop[:, 1], train_indices_nhop[:, 2]], axis=1)
    else:
        edge_list_nhop = None
        edge_type_nhop = None

    edge_embed = params["relation_embeddings"][edge_type]

    out_entity_1, out_relation_1 = spgat_forward(
        params["sparse_gat_1"], params["entity_embeddings"], params["relation_embeddings"],
        edge_list, edge_type, edge_embed, edge_list_nhop, edge_type_nhop,
        alpha, params["relation_embeddings"].shape[0])

    N = params["entity_embeddings"].shape[0]
    mask = jnp.zeros((N,), jnp.float32).at[batch_inputs[:, 2]].set(1.0)

    entities_upgraded = pallas_matmul(params["entity_embeddings"], params["W_entities"])
    out_entity_1 = pallas_finalize(entities_upgraded, out_entity_1, mask)
    return out_entity_1, out_relation_1


# ----------------------------- parameter init --------------------------------

def xavier_uniform(key, shape, gain=1.414):
    fan_in, fan_out = shape[0], shape[1]
    limit = gain * jnp.sqrt(6.0 / (fan_in + fan_out))
    return jax.random.uniform(key, shape, jnp.float32, -limit, limit)


def build_params(key, N, Din, R, Drel, out1, heads1, alpha):
    Dout = out1 * heads1
    ks = iter(jax.random.split(key, 32))

    initial_entity_emb = jax.random.normal(next(ks), (N, Din), jnp.float32)
    ent_norm = jnp.sqrt(jnp.sum(initial_entity_emb ** 2, axis=1, keepdims=True))
    entity_embeddings = initial_entity_emb / jnp.maximum(ent_norm, 1e-12)   # F.normalize
    relation_embeddings = jax.random.normal(next(ks), (R, Drel), jnp.float32)

    attn_heads = []
    for _ in range(heads1):
        attn_heads.append({
            "a":   xavier_uniform(next(ks), (out1, 2 * Din + Drel)),
            "a_2": xavier_uniform(next(ks), (1, out1)),
        })
    out_att = {
        "a":   xavier_uniform(next(ks), (Dout, 2 * Dout + Dout)),
        "a_2": xavier_uniform(next(ks), (1, Dout)),
    }
    rel_layer = {
        "W":           xavier_uniform(next(ks), (Drel, Dout)),
        "weights_rel": xavier_uniform(next(ks), (Dout, Drel)),  # nn.Linear weight (out, in)
    }
    sparse_gat_1 = {
        "merge_input_lambda":  jnp.float32(0.5),
        "merge_output_lambda": jnp.float32(0.5),
        "rel_layer": rel_layer,
        "attentions_inbound": attn_heads,
        "out_att_inbound": out_att,
    }
    params = {
        "entity_embeddings": entity_embeddings,
        "relation_embeddings": relation_embeddings,
        "W_entities": xavier_uniform(next(ks), (Din, Dout)),
        "sparse_gat_1": sparse_gat_1,
    }
    return params


# --------------------------------- main ---------------------------------------

if __name__ == "__main__":
    key = jax.random.PRNGKey(0)
    N, Din = 16, 16          # num_nodes, entity_in_dim
    R, Drel = 6, 16          # num_relation, relation_dim
    out1, heads1 = 8, 2      # entity_out_dim[0], nheads_GAT[0]  -> hidden 16
    E, E2, B = 20, 8, 6      # edges, n-hop edges, batch triples
    alpha = 0.2
    # drop_GAT = 0.0 -> dropout is identity

    params = build_params(key, N, Din, R, Drel, out1, heads1, alpha)

    k1, k2, k3, k4, k5, k6 = jax.random.split(jax.random.PRNGKey(1), 6)
    edge_list = jax.random.randint(k1, (2, E), 0, N, jnp.int32)
    # make sure every relation id appears at least once (keeps scatter_mean well-defined)
    edge_type = jnp.concatenate(
        [jnp.arange(R, dtype=jnp.int32),
         jax.random.randint(k2, (E - R,), 0, R, jnp.int32)])
    train_indices_nhop = jnp.stack(
        [jax.random.randint(k3, (E2,), 0, N, jnp.int32),   # col 0: entity
         jax.random.randint(k4, (E2,), 0, R, jnp.int32),   # col 1: relation
         jax.random.randint(k5, (E2,), 0, R, jnp.int32),   # col 2: relation
         jax.random.randint(k6, (E2,), 0, N, jnp.int32)],  # col 3: entity
        axis=1)
    batch_inputs = jnp.stack(
        [jax.random.randint(jax.random.PRNGKey(2), (B,), 0, N, jnp.int32),
         jax.random.randint(jax.random.PRNGKey(3), (B,), 0, R, jnp.int32),
         jax.random.randint(jax.random.PRNGKey(4), (B,), 0, N, jnp.int32)],
        axis=1)

    out_entity, out_relation = spkbgat_forward(
        params, (edge_list, edge_type), batch_inputs, train_indices_nhop, alpha)
    jax.block_until_ready((out_entity, out_relation))

    assert out_entity.shape == (N, out1 * heads1)
    assert out_relation.shape == (R, out1 * heads1)
    print("KERNEL_OK")
</pallas_src>

<mosaic_0001>
module attributes {stable_mosaic.version = 11 : i64} {
  func.func @_edge_attn_kernel(%arg0: i32, %arg1: memref<32x48xbf16, #tpu.memory_space<vmem>>, %arg2: memref<48x16xbf16, #tpu.memory_space<vmem>>, %arg3: memref<16x2xf32, #tpu.memory_space<vmem>>, %arg4: memref<2x16xf32, #tpu.memory_space<vmem>>, %arg5: memref<32x16xbf16, #tpu.memory_space<vmem>>, %arg6: memref<32x2xbf16, #tpu.memory_space<vmem>>) attributes {dimension_semantics = [#tpu.dimension_semantics<parallel>], iteration_bounds = array<i64: 1>, scalar_prefetch = 0 : i64, scratch_operands = 0 : i64, tpu.core_type = #tpu.core_type<tc>, window_params = [{transform_indices = @transform_0, window_bounds = array<i64: 32, 48>}, {pipeline_mode = #tpu.pipeline_mode<synchronous>, transform_indices = @transform_1, window_bounds = array<i64: 48, 16>}, {pipeline_mode = #tpu.pipeline_mode<synchronous>, transform_indices = @transform_2, window_bounds = array<i64: 16, 2>}, {pipeline_mode = #tpu.pipeline_mode<synchronous>, transform_indices = @transform_3, window_bounds = array<i64: 2, 16>}, {transform_indices = @transform_4, window_bounds = array<i64: 32, 16>}, {transform_indices = @transform_5, window_bounds = array<i64: 32, 2>}]} {
    %c0 = arith.constant 0 : index
    %c0_0 = arith.constant 0 : index
    %0 = vector.load %arg1[%c0, %c0_0] : memref<32x48xbf16, #tpu.memory_space<vmem>>, vector<32x48xbf16>
    %c0_1 = arith.constant 0 : index
    %c0_2 = arith.constant 0 : index
    %1 = vector.load %arg2[%c0_1, %c0_2] : memref<48x16xbf16, #tpu.memory_space<vmem>>, vector<48x16xbf16>
    %cst = arith.constant dense<0.000000e+00> : vector<32x16xf32>
    %2 = tpu.matmul %0, %1, %cst {dimension_numbers = #tpu.dot_dimension_numbers<[1], [0], [0], [1], [0, 0, 1, 1], [], []>} : vector<32x48xbf16>, vector<48x16xbf16>, vector<32x16xf32> -> vector<32x16xf32>
    %c0_3 = arith.constant 0 : index
    %c0_4 = arith.constant 0 : index
    %3 = vector.load %arg3[%c0_3, %c0_4] : memref<16x2xf32, #tpu.memory_space<vmem>>, vector<16x2xf32>
    %cst_5 = arith.constant dense<0.000000e+00> : vector<32x2xf32>
    %4 = tpu.matmul %2, %3, %cst_5 {dimension_numbers = #tpu.dot_dimension_numbers<[1], [0], [0], [1], [0, 0, 1, 1], [], []>} : vector<32x16xf32>, vector<16x2xf32>, vector<32x2xf32> -> vector<32x2xf32>
    %cst_6 = arith.constant 0.000000e+00 : f32
    %5 = vector.broadcast %cst_6 : f32 to vector<32x2xf32>
    %6 = arith.cmpf ogt, %4, %5 : vector<32x2xf32>
    %cst_7 = arith.constant 2.000000e-01 : f32
    %7 = vector.broadcast %cst_7 : f32 to vector<32x2xf32>
    %8 = arith.mulf %7, %4 : vector<32x2xf32>
    %9 = arith.select %6, %4, %8 : vector<32x2xi1>, vector<32x2xf32>
    %cst_8 = arith.constant 0.000000e+00 : f32
    %10 = vector.broadcast %cst_8 : f32 to vector<32x2xf32>
    %11 = arith.subf %10, %9 : vector<32x2xf32>
    %12 = math.exp %11 : vector<32x2xf32>
    %c0_9 = arith.constant 0 : index
    %c0_10 = arith.constant 0 : index
    %13 = vector.load %arg4[%c0_9, %c0_10] : memref<2x16xf32, #tpu.memory_space<vmem>>, vector<2x16xf32>
    %cst_11 = arith.constant dense<0.000000e+00> : vector<32x16xf32>
    %14 = tpu.matmul %12, %13, %cst_11 {dimension_numbers = #tpu.dot_dimension_numbers<[1], [0], [0], [1], [0, 0, 1, 1], [], []>} : vector<32x2xf32>, vector<2x16xf32>, vector<32x16xf32> -> vector<32x16xf32>
    %15 = arith.mulf %2, %14 : vector<32x16xf32>
    %16 = arith.truncf %15 : vector<32x16xf32> to vector<32x16xbf16>
    %c0_12 = arith.constant 0 : index
    %c0_13 = arith.constant 0 : index
    %17 = vector.load %arg5[%c0_12, %c0_13] : memref<32x16xbf16, #tpu.memory_space<vmem>>, vector<32x16xbf16>
    tpu.vector_store %arg5[%c0_12, %c0_13], %16 {strides = array<i32>} : memref<32x16xbf16, #tpu.memory_space<vmem>>, vector<32x16xbf16>,
    %18 = arith.truncf %12 : vector<32x2xf32> to vector<32x2xbf16>
    %c0_14 = arith.constant 0 : index
    %c0_15 = arith.constant 0 : index
    %19 = vector.load %arg6[%c0_14, %c0_15] : memref<32x2xbf16, #tpu.memory_space<vmem>>, vector<32x2xbf16>
    tpu.vector_store %arg6[%c0_14, %c0_15], %18 {strides = array<i32>} : memref<32x2xbf16, #tpu.memory_space<vmem>>, vector<32x2xbf16>,
    return
  }
  func.func @transform_0(%arg0: i32) -> (i32, i32) {
    %c0_i32 = arith.constant 0 : i32
    %c0_i32_0 = arith.constant 0 : i32
    return %arg0, %c0_i32 : i32, i32
  }
  func.func @transform_1(%arg0: i32) -> (i32, i32) {
    %c0_i32 = arith.constant 0 : i32
    %c0_i32_0 = arith.constant 0 : i32
    %c0_i32_1 = arith.constant 0 : i32
    return %c0_i32, %c0_i32_0 : i32, i32
  }
  func.func @transform_2(%arg0: i32) -> (i32, i32) {
    %c0_i32 = arith.constant 0 : i32
    %c0_i32_0 = arith.constant 0 : i32
    %c0_i32_1 = arith.constant 0 : i32
    return %c0_i32, %c0_i32_0 : i32, i32
  }
  func.func @transform_3(%arg0: i32) -> (i32, i32) {
    %c0_i32 = arith.constant 0 : i32
    %c0_i32_0 = arith.constant 0 : i32
    %c0_i32_1 = arith.constant 0 : i32
    return %c0_i32, %c0_i32_0 : i32, i32
  }
  func.func @transform_4(%arg0: i32) -> (i32, i32) {
    %c0_i32 = arith.constant 0 : i32
    %c0_i32_0 = arith.constant 0 : i32
    return %arg0, %c0_i32 : i32, i32
  }
  func.func @transform_5(%arg0: i32) -> (i32, i32) {
    %c0_i32 = arith.constant 0 : i32
    %c0_i32_0 = arith.constant 0 : i32
    return %arg0, %c0_i32 : i32, i32
  }
}

</mosaic_0001>

<bundles_post_ra>
// kernel: tpu_custom_call.1
= control target key start
LH: loop header
LB: loop body
LE: loop exit
PB: predicated region body
PF: predicated region fallthrough
CT: control target
= control target key end

     0   :  { %vm58_vm0 = vcmask 392192   ;;  %vm116_vm1 = vcmask 130048   ;;  %vm252_vm2 = vcmask 1041408   ;;  %vm239_vm7 = vcmask 15360   ;;  %s582_s1 = inlined_call_operand.vmem [shape: bf16[48,16], index: 1, kind: input, shape index: {}]   ;;  %s583_s0 = inlined_call_operand.vmem [shape: bf16[32,48], index: 0, kind: input, shape index: {}]   ;;  %s584_s2 = inlined_call_operand.vmem [shape: f32[16,2], index: 2, kind: input, shape index: {}]   ;;  %s585_s3 = inlined_call_operand.vmem [shape: f32[2,16], index: 3, kind: input, shape index: {}]   ;;  %s586_s5 = inlined_call_operand.vmem [shape: bf16[32,2], index: 5, kind: output, shape index: {1}]   ;;  %s587_s4 = inlined_call_operand.vmem [shape: bf16[32,16], index: 4, kind: output, shape index: {0}]  }
   0x1   :  { %v475_v0 = vld [vmem:[%s582_s1] sm:$0xff]   ;;  %v476_v1 = vld [vmem:[%s582_s1 + $0x8] sm:$0xff]   ;;  %v477_v3 = vld [vmem:[%s582_s1 + $0x10] sm:$0xff]   ;;  %vm382_vm8 = vcmask 11264   ;;  %vm361_vm9 = vcmask 125952  }
   0x2   :  { %443 = vmatprep.subr.bf16.mxu0 %v475_v0  ;;  %v478_v2 = vld [vmem:[%s583_s0] sm:$0xff]   ;;  %v479_v4 = vld [vmem:[%s583_s0 + $0x8] sm:$0xff]  }
   0x3   :  { %444 = vmatpush3.bf16.msra.mxu0 %v475_v0  ;;  %449 = vmatprep.mubr.msk.bf16.mxu0 %vm58_vm0, %v478_v2  ;;  %v114_v5 = vld [vmem:[%s584_s2] sm:$0xff]  ;;  %v115_v6 = vld [vmem:[%s584_s2 + $0x8] sm:$0xff] }
   0x4   :  { %445 = vmatprep.subr.bf16.mxu0 %v476_v1  ;;  %v471_v7 = vpack.c.bf16 %v115_v6, %v114_v5  ;;  %v238_v12 = vld [vmem:[%s585_s3] sm:$0x3] }
   0x6   :  { %472 = vmatprep.subr.bf16.mxu1 %v471_v7 }
   0x7   :  { %446 = vmatpush3.bf16.msra.mxu0 %v476_v1  ;;  %474 = vmatpush3.bf16.msra.mxu1 %v471_v7 }
   0x8   :  { %447 = vmatprep.subr.bf16.mxu0 %v477_v3  ;;  %463 = vmatprep.subr.msk.mxu1 %vm252_vm2, %v238_v12 }
   0xb   :  { %448 = vmatpush3.bf16.msra.mxu0 %v477_v3 }
   0xe   :  { %450 = vmatmul.mubr.msk.bf16.vlgmr.msra.gmra.mrb[0].mxu0 %vm58_vm0, %v479_v4 }
  0xe1   :  { %v539_v8 = vpop.f32.mrb[0].mxu0 }
  0xe2   :  { %v541_v9 = vpop.f32.mrb[1].mxu0 }
  0xe3   :  { %v543_v10 = vpop.f32.mrb[2].mxu0  ;;  %457 = vmatprep.mubr.msk.f32.mxu1 %vm116_vm1, %v541_v9 }
  0xe4   :  { %v102_v11 = vpop.f32.mrb[3].mxu0 }
  0xe5   :  { %458 = vmatmul.mubr.msk.f32.vlgmr.msra.gmra.mrb[0].mxu1 %vm116_vm1, %v102_v11 }
  0xe6   :  { %460 = vmatprep.mubr.msk.f32.mxu1 %vm116_vm1, %v539_v8  ;;  %464 = vmatpush3.msk.msra.mxu1 %vm252_vm2, %v238_v12 }
  0xe9   :  { %461 = vmatmul.mubr.msk.f32.gmra.mrb[2].mxu1 %vm116_vm1, %v543_v10 }
 0x1b8   :  { %v459_v13 = vpop.f32.mrb[0].mxu1 }
 0x1b9   :  { %vm215_vm3 = vcmp.gt.f32.partialorder %v459_v13, 0.0  ;;  %v219_v14 = vmul.f32 0.2, %v459_v13  ;;  %v195_v15 = vpop.f32.mrb[1].mxu1 }
 0x1ba   :  { %vm214_vm4 = vcmp.gt.f32.partialorder %v195_v15, 0.0  ;;  %v218_v16 = vmul.f32 0.2, %v195_v15 }
 0x1bb   :  { %v223_v17 = vsel %vm215_vm3, %v459_v13, %v219_v14 }
 0x1bc   :  { %v227_v18 = vsub.f32 0.0, %v223_v17  ;;  %v222_v19 = vsel %vm214_vm4, %v195_v15, %v218_v16  ;;  %v462_v20 = vpop.f32.mrb[2].mxu1 }
 0x1bd   :  { %v226_v21 = vsub.f32 0.0, %v222_v19  ;;  %vm217_vm5 = vcmp.gt.f32.partialorder %v462_v20, 0.0  ;;  %v221_v22 = vmul.f32 0.2, %v462_v20  ;;  %v205_v23 = vpop.f32.mrb[3].mxu1 }
 0x1be   :  { %v232_v24 = vmul.f32 1.442695, %v227_v18  ;;  %vm216_vm6 = vcmp.gt.f32.partialorder %v205_v23, 0.0  ;;  %v220_v25 = vmul.f32 0.2, %v205_v23 }
 0x1bf   :  { %v230_v26 = vmul.f32 1.442695, %v226_v21  ;;  %v225_v27 = vsel %vm217_vm5, %v462_v20, %v221_v22 }
 0x1c0   :  { %480 = vpow2.f32 %v232_v24  ;;  %v229_v28 = vsub.f32 0.0, %v225_v27  ;;  %v224_v29 = vsel %vm216_vm6, %v205_v23, %v220_v25 }
 0x1c1   :  { %482 = vpow2.f32 %v230_v26  ;;  %v228_v30 = vsub.f32 0.0, %v224_v29 }
 0x1c2   :  { %v236_v31 = vmul.f32 1.442695, %v229_v28 }
 0x1c3   :  { %v234_v32 = vmul.f32 1.442695, %v228_v30 }
 0x1c4   :  { %484 = vpow2.f32 %v236_v31 }
 0x1c5   :  { %486 = vpow2.f32 %v234_v32 }
 0x1ca   :  { %v481_v33 = vpop.eup %480 }
 0x1cb   :  { %v483_v34 = vpop.eup %482  ;;  %v424_v35 = vpack.c.bf16 %v481_v33, %v481_v33 }
 0x1cc   :  { %v423_v36 = vpack.c.bf16 %v483_v34, %v483_v34  ;;  %465 = vmatprep.mubr.msk.f32.mxu1 %vm239_vm7, %v483_v34 }
 0x1cd   :  { %384 = vst.msk [vmem:[%s586_s5 + $0x4] sm:$0xf] %vm382_vm8, %v424_v35  ;;  %466 = vmatmul.mubr.msk.f32.vlgmr.msra.gmra.mrb[4].mxu1 %vm239_vm7, %v481_v33 }
 0x1ce   :  { %v485_v37 = vpop.eup %484  ;;  %383 = vst.msk [vmem:[%s586_s5] sm:$0xf] %vm382_vm8, %v423_v36 }
 0x1cf   :  { %v487_v38 = vpop.eup %486  ;;  %v426_v39 = vpack.c.bf16 %v485_v37, %v485_v37 }
 0x1d0   :  { %v425_v40 = vpack.c.bf16 %v487_v38, %v487_v38  ;;  %468 = vmatprep.mubr.msk.f32.mxu1 %vm239_vm7, %v487_v38 }
 0x1d1   :  { %386 = vst.msk [vmem:[%s586_s5 + $0xc] sm:$0xf] %vm382_vm8, %v426_v39  ;;  %469 = vmatmul.mubr.msk.f32.gmra.mrb[6].mxu1 %vm239_vm7, %v485_v37 }
 0x1d2   :  { %385 = vst.msk [vmem:[%s586_s5 + $0x8] sm:$0xf] %vm382_vm8, %v425_v40 }
 0x2a0   :  { %v467_v41 = vpop.f32.mrb[4].mxu1 }
 0x2a1   :  { %v342_v42 = vmul.f32 %v467_v41, %v102_v11  ;;  %v322_v43 = vpop.f32.mrb[5].mxu1 }
 0x2a2   :  { %v341_v44 = vmul.f32 %v322_v43, %v541_v9 }
 0x2a3   :  { %v420_v45 = vpack.c.bf16 %v342_v42, %v342_v42 }
 0x2a4   :  { %v419_v46 = vpack.c.bf16 %v341_v44, %v341_v44  ;;  %v470_v47 = vpop.f32.mrb[6].mxu1 }
 0x2a5   :  { %363 = vst.msk [vmem:[%s587_s4 + $0x4] sm:$0xf] %vm361_vm9, %v420_v45  ;;  %v344_v48 = vmul.f32 %v470_v47, %v543_v10  ;;  %v332_v49 = vpop.f32.mrb[7].mxu1 }
 0x2a6   :  { %362 = vst.msk [vmem:[%s587_s4] sm:$0xf] %vm361_vm9, %v419_v46  ;;  %v343_v50 = vmul.f32 %v539_v8, %v332_v49 }
 0x2a7   :  { %v422_v51 = vpack.c.bf16 %v344_v48, %v344_v48 }
 0x2a8   :  { %v421_v52 = vpack.c.bf16 %v343_v50, %v343_v50 }
 0x2a9   :  { %365 = vst.msk [vmem:[%s587_s4 + $0xc] sm:$0xf] %vm361_vm9, %v422_v51 }
 0x2aa   :  { %364 = vst.msk [vmem:[%s587_s4 + $0x8] sm:$0xf] %vm361_vm9, %v421_v52 }

</bundles_post_ra>
